<compile_context>
chip_gen: v6e
topology: v6e:2x2x1
jax: 0.10.0
libtpu: 0.0.40
codegen_flags: <defaults>
</compile_context>

<pallas_src>
import jax
import jax.numpy as jnp
from jax import lax
from jax.experimental import pallas as pl
from jax.experimental.pallas import tpu as pltpu

# ---------------- configuration (small, consistent with the module) --------
N_BATCH = 2       # N
C_IN = 4          # input channels (one-hot DNA)
SEQ_LEN = 16      # L
HIDDEN = 32       # embedding channels
KSIZE = 5         # embedding conv kernel size (padding = "same")
N_TASKS = 1       # head.n_tasks
PAD = (KSIZE - 1) // 2

KC = KSIZE * C_IN            # im2col rows (before the ones row)
NL = N_BATCH * SEQ_LEN       # fused batch*length lane extent


# ---------------- Pallas kernel --------------------------------------------
def base_model_kernel(x_ref, w_emb_ref, w_head_ref, o_ref, xcols_ref):
    """Single invocation (grid=()): whole problem at once.

    x_ref:      (N, C_IN, L)          PyTorch-native NCL input, consumed directly
    w_emb_ref:  (HIDDEN+1, KC+1)      [w_im2col | b_emb] + selector row for the ones row
    w_head_ref: (HIDDEN+1, N_TASKS)   [w_head ; b_head] as a column
    o_ref:      (N_TASKS, N*L)        lane-dense output block
    xcols_ref:  (KC+1, N*L)           VMEM scratch: im2col matrix + ones row
    """
    # One store: zeros everywhere, ones on the bias-carrier row (row KC).
    row_ids = lax.broadcasted_iota(jnp.int32, (KC + 1, NL), 0)
    xcols_ref[...] = jnp.where(row_ids == KC, 1.0, 0.0).astype(jnp.float32)

    # im2col via static slice stores (no pad/concat shuffles). For tap k with
    # shift s = k - PAD, column l of batch b receives x[b, :, l + s]; columns
    # falling outside [0, L) stay zero (== "same" padding).
    for b in range(N_BATCH):
        x_b = x_ref[b]                                   # (C_IN, L)
        c0 = b * SEQ_LEN
        for k in range(KSIZE):
            s = k - PAD
            r0 = k * C_IN
            if s >= 0:
                xcols_ref[r0:r0 + C_IN, c0:c0 + SEQ_LEN - s] = x_b[:, s:SEQ_LEN]
            else:
                xcols_ref[r0:r0 + C_IN, c0 - s:c0 + SEQ_LEN] = x_b[:, 0:SEQ_LEN + s]

    x_cols = xcols_ref[...]                              # (KC+1, N*L)

    # Embedding conv + bias + ReLU for the WHOLE batch as one MXU matmul.
    # Last row of h is ReLU(1) == 1 (bias carrier for the head).
    h = jnp.dot(w_emb_ref[...], x_cols, preferred_element_type=jnp.float32)
    h = jnp.maximum(h, 0.0)                              # (HIDDEN+1, N*L)

    # Head (1x1 conv, N_TASKS == 1): VPU multiply + sublane (XLU) reduction;
    # bias included via the ones row. (On v7x a (1,33)@(33,32) matmul is
    # equivalent thanks to the MRB.)
    out = jnp.sum(h * w_head_ref[...], axis=0, keepdims=True)   # (1, N*L)
    o_ref[...] = out.astype(o_ref.dtype)


# ---------------- parameter preparation (one-time, hoisted) ----------------
def prepare_params(w_emb_oik, b_emb, w_head, b_head):
    """PyTorch-native layouts -> kernel layouts. Call once, reuse per forward.

    w_emb_oik: (HIDDEN, C_IN, KSIZE), b_emb: (HIDDEN,)
    w_head:    (N_TASKS, HIDDEN),     b_head: (N_TASKS,)
    """
    assert N_TASKS == 1  # reduction-based head assumes a single task row
    # (O, C, K) -> (O, K, C) -> (O, K*C): tap-major / channel-minor to match
    # the in-kernel im2col row order; append b_emb as the bias column.
    w_im2col = jnp.transpose(w_emb_oik, (0, 2, 1)).reshape(HIDDEN, KC)
    w_emb_aug = jnp.concatenate([w_im2col, b_emb.reshape(HIDDEN, 1)], axis=1)
    # Selector row: picks out the ones row of x_cols so h's last row == 1
    # after ReLU (bias carrier for the head).
    sel_row = jnp.zeros((1, KC + 1), jnp.float32).at[0, KC].set(1.0)
    w_emb_aug = jnp.concatenate([w_emb_aug, sel_row], axis=0)    # (HIDDEN+1, KC+1)

    # Head weight as a column with the bias appended: (HIDDEN+1, N_TASKS).
    w_head_col = jnp.concatenate(
        [w_head.T.astype(jnp.float32), b_head.reshape(1, N_TASKS).astype(jnp.float32)],
        axis=0)
    return w_emb_aug.astype(jnp.float32), w_head_col


# ---------------- forward ----------------------------------------------------
def base_model_forward(x_ncl, w_emb_aug, w_head_col):
    """x_ncl: (N, C_IN, L) -> (N, N_TASKS, L), matching the PyTorch module."""
    n, c, l = x_ncl.shape
    assert (n, c, l) == (N_BATCH, C_IN, SEQ_LEN)

    out_flat = pl.pallas_call(
        base_model_kernel,
        out_shape=jax.ShapeDtypeStruct((N_TASKS, NL), jnp.float32),
        in_specs=[
            pl.BlockSpec(memory_space=pltpu.MemorySpace.VMEM),   # x (N, C, L)
            pl.BlockSpec(memory_space=pltpu.MemorySpace.VMEM),   # w_emb_aug
            pl.BlockSpec(memory_space=pltpu.MemorySpace.VMEM),   # w_head_col
        ],
        out_specs=pl.BlockSpec(memory_space=pltpu.MemorySpace.VMEM),
        scratch_shapes=[pltpu.VMEM((KC + 1, NL), jnp.float32)],  # im2col scratch
    )(x_ncl, w_emb_aug, w_head_col)

    # (N_TASKS, N*L) -> (N, N_TASKS, L): metadata-only since N_TASKS == 1.
    return out_flat.reshape(N_BATCH, N_TASKS, SEQ_LEN)


# ---------------- pure-JAX reference (for verification) --------------------
def reference_forward(x_ncl, w_emb_oik, b_emb, w_head, b_head):
    dn = ("NCH", "OIH", "NCH")
    y = lax.conv_general_dilated(
        x_ncl, w_emb_oik, window_strides=(1,), padding=[(PAD, PAD)],
        dimension_numbers=dn,
    ) + b_emb[None, :, None]
    y = jnp.maximum(y, 0.0)
    w_head_oik = w_head[:, :, None]  # (N_TASKS, HIDDEN, 1)
    out = lax.conv_general_dilated(
        y, w_head_oik, window_strides=(1,), padding=[(0, 0)],
        dimension_numbers=dn,
    ) + b_head[None, :, None]
    return out


# ---------------- main ------------------------------------------------------
if __name__ == "__main__":
    key = jax.random.PRNGKey(0)
    k_x, k_we, k_be, k_wh, k_bh = jax.random.split(key, 5)

    # deterministic synthetic parameters in PyTorch-native layouts
    x = jax.random.normal(k_x, (N_BATCH, C_IN, SEQ_LEN), dtype=jnp.float32)
    w_emb = jax.random.normal(k_we, (HIDDEN, C_IN, KSIZE), dtype=jnp.float32) * 0.1
    b_emb = jax.random.normal(k_be, (HIDDEN,), dtype=jnp.float32) * 0.1
    w_head = jax.random.normal(k_wh, (N_TASKS, HIDDEN), dtype=jnp.float32) * 0.1
    b_head = jax.random.normal(k_bh, (N_TASKS,), dtype=jnp.float32) * 0.1

    # One-time parameter preparation (hoisted out of the per-call wrapper).
    w_emb_aug, w_head_col = prepare_params(w_emb, b_emb, w_head, b_head)
    w_emb_aug = jax.block_until_ready(w_emb_aug)
    w_head_col = jax.block_until_ready(w_head_col)

    out = base_model_forward(x, w_emb_aug, w_head_col)
    out = jax.block_until_ready(out)

    ref = reference_forward(x, w_emb, b_emb, w_head, b_head)
    assert out.shape == (N_BATCH, N_TASKS, SEQ_LEN), out.shape
    assert jnp.allclose(out, ref, rtol=1e-4, atol=1e-4), "mismatch vs reference"

    print("KERNEL_OK")
</pallas_src>

<mosaic_0001>
module attributes {stable_mosaic.version = 11 : i64} {
  func.func @base_model_kernel(%arg0: memref<2x4x16xf32, #tpu.memory_space<vmem>>, %arg1: memref<33x21xf32, #tpu.memory_space<vmem>>, %arg2: memref<33x1xf32, #tpu.memory_space<vmem>>, %arg3: memref<1x32xf32, #tpu.memory_space<vmem>>, %arg4: memref<21x32xf32, #tpu.memory_space<vmem>>) attributes {dimension_semantics = [], scalar_prefetch = 0 : i64, scratch_operands = 1 : i64, tpu.core_type = #tpu.core_type<tc>} {
    %0 = tpu.iota {dimensions = array<i32: 0>} : vector<21x32xi32>
    %c20_i32 = arith.constant 20 : i32
    %1 = vector.broadcast %c20_i32 : i32 to vector<21x32xi32>
    %2 = arith.cmpi eq, %0, %1 : vector<21x32xi32>
    %cst = arith.constant 1.000000e+00 : f32
    %cst_0 = arith.constant 0.000000e+00 : f32
    %3 = vector.broadcast %cst : f32 to vector<21x32xf32>
    %4 = vector.broadcast %cst_0 : f32 to vector<21x32xf32>
    %5 = arith.select %2, %3, %4 : vector<21x32xi1>, vector<21x32xf32>
    %c0 = arith.constant 0 : index
    %c0_1 = arith.constant 0 : index
    %6 = vector.load %arg4[%c0, %c0_1] : memref<21x32xf32, #tpu.memory_space<vmem>>, vector<21x32xf32>
    tpu.vector_store %arg4[%c0, %c0_1], %5 {strides = array<i32>} : memref<21x32xf32, #tpu.memory_space<vmem>>, vector<21x32xf32>,
    %c0_2 = arith.constant 0 : index
    %c0_3 = arith.constant 0 : index
    %c0_4 = arith.constant 0 : index
    %7 = vector.load %arg0[%c0_2, %c0_3, %c0_4] : memref<2x4x16xf32, #tpu.memory_space<vmem>>, vector<1x4x16xf32>
    %8 = vector.shape_cast %7 : vector<1x4x16xf32> to vector<4x16xf32>
    %9 = vector.extract_strided_slice %8 {offsets = [0, 0], sizes = [4, 14], strides = [1, 1]} : vector<4x16xf32> to vector<4x14xf32>
    %c0_5 = arith.constant 0 : index
    %c2 = arith.constant 2 : index
    %10 = vector.load %arg4[%c0_5, %c2] : memref<21x32xf32, #tpu.memory_space<vmem>>, vector<4x14xf32>
    tpu.vector_store %arg4[%c0_5, %c2], %9 {strides = array<i32>} : memref<21x32xf32, #tpu.memory_space<vmem>>, vector<4x14xf32>,
    %11 = vector.extract_strided_slice %8 {offsets = [0, 0], sizes = [4, 15], strides = [1, 1]} : vector<4x16xf32> to vector<4x15xf32>
    %c4 = arith.constant 4 : index
    %c1 = arith.constant 1 : index
    %12 = vector.load %arg4[%c4, %c1] : memref<21x32xf32, #tpu.memory_space<vmem>>, vector<4x15xf32>
    tpu.vector_store %arg4[%c4, %c1], %11 {strides = array<i32>} : memref<21x32xf32, #tpu.memory_space<vmem>>, vector<4x15xf32>,
    %c8 = arith.constant 8 : index
    %c0_6 = arith.constant 0 : index
    %13 = vector.load %arg4[%c8, %c0_6] : memref<21x32xf32, #tpu.memory_space<vmem>>, vector<4x16xf32>
    tpu.vector_store %arg4[%c8, %c0_6], %8 {strides = array<i32>} : memref<21x32xf32, #tpu.memory_space<vmem>>, vector<4x16xf32>,
    %14 = vector.extract_strided_slice %8 {offsets = [0, 1], sizes = [4, 15], strides = [1, 1]} : vector<4x16xf32> to vector<4x15xf32>
    %c12 = arith.constant 12 : index
    %c0_7 = arith.constant 0 : index
    %15 = vector.load %arg4[%c12, %c0_7] : memref<21x32xf32, #tpu.memory_space<vmem>>, vector<4x15xf32>
    tpu.vector_store %arg4[%c12, %c0_7], %14 {strides = array<i32>} : memref<21x32xf32, #tpu.memory_space<vmem>>, vector<4x15xf32>,
    %16 = vector.extract_strided_slice %8 {offsets = [0, 2], sizes = [4, 14], strides = [1, 1]} : vector<4x16xf32> to vector<4x14xf32>
    %c16 = arith.constant 16 : index
    %c0_8 = arith.constant 0 : index
    %17 = vector.load %arg4[%c16, %c0_8] : memref<21x32xf32, #tpu.memory_space<vmem>>, vector<4x14xf32>
    tpu.vector_store %arg4[%c16, %c0_8], %16 {strides = array<i32>} : memref<21x32xf32, #tpu.memory_space<vmem>>, vector<4x14xf32>,
    %c1_9 = arith.constant 1 : index
    %c0_10 = arith.constant 0 : index
    %c0_11 = arith.constant 0 : index
    %18 = vector.load %arg0[%c1_9, %c0_10, %c0_11] : memref<2x4x16xf32, #tpu.memory_space<vmem>>, vector<1x4x16xf32>
    %19 = vector.shape_cast %18 : vector<1x4x16xf32> to vector<4x16xf32>
    %20 = vector.extract_strided_slice %19 {offsets = [0, 0], sizes = [4, 14], strides = [1, 1]} : vector<4x16xf32> to vector<4x14xf32>
    %c0_12 = arith.constant 0 : index
    %c18 = arith.constant 18 : index
    %21 = vector.load %arg4[%c0_12, %c18] : memref<21x32xf32, #tpu.memory_space<vmem>>, vector<4x14xf32>
    tpu.vector_store %arg4[%c0_12, %c18], %20 {strides = array<i32>} : memref<21x32xf32, #tpu.memory_space<vmem>>, vector<4x14xf32>,
    %22 = vector.extract_strided_slice %19 {offsets = [0, 0], sizes = [4, 15], strides = [1, 1]} : vector<4x16xf32> to vector<4x15xf32>
    %c4_13 = arith.constant 4 : index
    %c17 = arith.constant 17 : index
    %23 = vector.load %arg4[%c4_13, %c17] : memref<21x32xf32, #tpu.memory_space<vmem>>, vector<4x15xf32>
    tpu.vector_store %arg4[%c4_13, %c17], %22 {strides = array<i32>} : memref<21x32xf32, #tpu.memory_space<vmem>>, vector<4x15xf32>,
    %c8_14 = arith.constant 8 : index
    %c16_15 = arith.constant 16 : index
    %24 = vector.load %arg4[%c8_14, %c16_15] : memref<21x32xf32, #tpu.memory_space<vmem>>, vector<4x16xf32>
    tpu.vector_store %arg4[%c8_14, %c16_15], %19 {strides = array<i32>} : memref<21x32xf32, #tpu.memory_space<vmem>>, vector<4x16xf32>,
    %25 = vector.extract_strided_slice %19 {offsets = [0, 1], sizes = [4, 15], strides = [1, 1]} : vector<4x16xf32> to vector<4x15xf32>
    %c12_16 = arith.constant 12 : index
    %c16_17 = arith.constant 16 : index
    %26 = vector.load %arg4[%c12_16, %c16_17] : memref<21x32xf32, #tpu.memory_space<vmem>>, vector<4x15xf32>
    tpu.vector_store %arg4[%c12_16, %c16_17], %25 {strides = array<i32>} : memref<21x32xf32, #tpu.memory_space<vmem>>, vector<4x15xf32>,
    %27 = vector.extract_strided_slice %19 {offsets = [0, 2], sizes = [4, 14], strides = [1, 1]} : vector<4x16xf32> to vector<4x14xf32>
    %c16_18 = arith.constant 16 : index
    %c16_19 = arith.constant 16 : index
    %28 = vector.load %arg4[%c16_18, %c16_19] : memref<21x32xf32, #tpu.memory_space<vmem>>, vector<4x14xf32>
    tpu.vector_store %arg4[%c16_18, %c16_19], %27 {strides = array<i32>} : memref<21x32xf32, #tpu.memory_space<vmem>>, vector<4x14xf32>,
    %c0_20 = arith.constant 0 : index
    %c0_21 = arith.constant 0 : index
    %29 = vector.load %arg4[%c0_20, %c0_21] : memref<21x32xf32, #tpu.memory_space<vmem>>, vector<21x32xf32>
    %c0_22 = arith.constant 0 : index
    %c0_23 = arith.constant 0 : index
    %30 = vector.load %arg1[%c0_22, %c0_23] : memref<33x21xf32, #tpu.memory_space<vmem>>, vector<33x21xf32>
    %cst_24 = arith.constant dense<0.000000e+00> : vector<33x32xf32>
    %31 = tpu.matmul %30, %29, %cst_24 {dimension_numbers = #tpu.dot_dimension_numbers<[1], [0], [0], [1], [0, 0, 1, 1], [], []>} : vector<33x21xf32>, vector<21x32xf32>, vector<33x32xf32> -> vector<33x32xf32>
    %cst_25 = arith.constant 0.000000e+00 : f32
    %32 = vector.broadcast %cst_25 : f32 to vector<33x32xf32>
    %33 = arith.maximumf %31, %32 : vector<33x32xf32>
    %c0_26 = arith.constant 0 : index
    %c0_27 = arith.constant 0 : index
    %34 = vector.load %arg2[%c0_26, %c0_27] : memref<33x1xf32, #tpu.memory_space<vmem>>, vector<33x1xf32>
    %35 = vector.broadcast %34 : vector<33x1xf32> to vector<33x32xf32>
    %36 = arith.mulf %33, %35 : vector<33x32xf32>
    %cst_28 = arith.constant dense<0.000000e+00> : vector<32xf32>
    %37 = vector.multi_reduction <add>, %36, %cst_28 [0] : vector<33x32xf32> to vector<32xf32>
    %38 = vector.shape_cast %37 : vector<32xf32> to vector<1x32xf32>
    %c0_29 = arith.constant 0 : index
    %c0_30 = arith.constant 0 : index
    %39 = vector.load %arg3[%c0_29, %c0_30] : memref<1x32xf32, #tpu.memory_space<vmem>>, vector<1x32xf32>
    tpu.vector_store %arg3[%c0_29, %c0_30], %38 {strides = array<i32>} : memref<1x32xf32, #tpu.memory_space<vmem>>, vector<1x32xf32>,
    return
  }
}

</mosaic_0001>

<bundles_post_ra>
// kernel: tpu_custom_call.1
= control target key start
LH: loop header
LB: loop body
LE: loop exit
PB: predicated region body
PF: predicated region fallthrough
CT: control target
= control target key end

     0   :  { %v15_v1 = vlaneseq  ;;  %s350_s14 = smov 126   ;;  %s351_s15 = smov 127   ;;  %vm25_vm0 = vcmask 261120   ;;  %vm42_vm1 = vcmask 125952   ;;  %v352_v4 = vmov 0.0   ;;  %s447_s0 = inlined_call_operand.vmem [shape: f32[2,4,16], index: 0, kind: input, shape index: {}]   ;;  %s448_s1 = inlined_call_operand.vmem [shape: f32[33,21], index: 1, kind: input, shape index: {}]   ;;  %s449_s2 = inlined_call_operand.vmem [shape: f32[33,1], index: 2, kind: input, shape index: {}]   ;;  %s450_s3 = inlined_call_operand.hbm [shape: f32[1,32], index: 3, kind: output, shape index: {}]  }
   0x1   :  { %v30_v0 = vld [vmem:[%s447_s0] sm:$0xf]  ;;  %v271_v2 = vld [vmem:[%s447_s0 + $0x4] sm:$0xf]  ;;  %286 = vmatprep.subr.mxu0 %v352_v4  ;;  %307 = vmatprep.subr.mxu1 %v352_v4  ;;  %27 = vst.msk [vmem:[#allocation2 + $0x8] sm:$0xff] %vm25_vm0, %v352_v4  ;;  %26 = vst.msk [vmem:[#allocation2] sm:$0xff] %vm25_vm0, %v352_v4 }
   0x2   :  { %49 = vrot.lane.b32.xlu0 %v30_v0, %s350_s14  ;;  %44 = vrot.lane.b32.xlu1 %v30_v0, %s351_s15  ;;  %v16_v3 = vshrl.u32 %v15_v1, 7  ;;  %43 = vst.msk [vmem:[#allocation2 + $0x8] sm:$0xf] %vm42_vm1, %v30_v0  ;;  %s353_s18 = smov 14   ;;  %s354_s19 = smov 16   ;;  %vm28_vm2 = vcmask 258048  }
   0x4   :  { %v18_v5 = vadd.s32 16, %v16_v3 }
   0x6   :  { %77 = vrot.lane.b32.xlu0 %v271_v2, %s353_s18  ;;  %67 = vrot.lane.b32.xlu1 %v271_v2, %s354_s19 }
   0x7   :  { %8 = vsyncpa [#allocation4], 0  ;;  %vm21_vm3 = vcmp.eq.s32.totalorder %v18_v5, 20  ;;  %s355_s0 = smov 15   ;;  %s356_s20 = smov 2   ;;  %vm357_vm4 = vmmov 0  }
   0x8   :  { %v24_v6 = vsel %vm21_vm3, 1.0, %v352_v4  ;;  %292 = vmatprep.mubr.msk.f32.mxu0 %vm357_vm4, %v352_v4  ;;  %301 = vmatprep.mubr.msk.f32.mxu1 %vm357_vm4, %v352_v4  ;;  %s358_s21 = smov 1   ;;  %s359_s22 = smov 18   ;;  %v205_v7 = vld [vmem:[%s449_s2] sm:$0xff]  ;;  %v361_v8 = vmov 0   ;;  %v206_v9 = vld [vmem:[%s449_s2 + $0x8] sm:$0xff] }
   0x9   :  { %29 = vst.msk [vmem:[#allocation2 + $0x10] sm:$0x1f] %vm28_vm2, %v24_v6  ;;  %s360_s23 = smov 17   ;;  %326 = vset.pattern.permute.xlu1 %v361_v8  ;;  %327 = vset.pattern.permute.xlu0 %v361_v8  ;;  %v207_v10 = vld [vmem:[%s449_s2 + $0x10] sm:$0xff]  ;;  %v209_v11 = vld [vmem:[%s449_s2 + $0x20] sm:$0x1] }
   0xa   :  { %72 = vrot.lane.b32.xlu0 %v271_v2, %s355_s0  ;;  %32 = vrot.lane.b32.xlu1 %v30_v0, %s356_s20  ;;  %v208_v12 = vld [vmem:[%s449_s2 + $0x18] sm:$0xff]  ;;  %vm52_vm5 = vcmask 109568   ;;  %vm47_vm6 = vcmask 117760   ;;  %vm80_vm7 = vcmask 240768   ;;  %vm70_vm8 = vcmask 257152   ;;  %v85_v24 = vld [vmem:[%s448_s1] sm:$0xff] }
   0xb   :  { %vm75_vm9 = vcmask 248960   ;;  %vm35_vm10 = vcmask 125968   ;;  %vm40_vm11 = vcmask 125960   ;;  %vm106_vm12 = vcmask 1044480   ;;  %v88_v25 = vld [vmem:[%s448_s1 + $0x18] sm:$0xff]  ;;  %v86_v27 = vld [vmem:[%s448_s1 + $0x8] sm:$0xff] }
   0xc   :  { %vm60_vm13 = vcmask 257168   ;;  %vm65_vm14 = vcmask 257160   ;;  %vm90_vm15 = vcmask 171008   ;;  %v89_v28 = vld [vmem:[%s448_s1 + $0x20] sm:$0x1]  ;;  %v87_v29 = vld [vmem:[%s448_s1 + $0x10] sm:$0xff] }
   0xd   :  { %vm247_vm1 = vcmask 253952   ;;  %s362_s1 = smov [#allocation3]  }
   0xe   :  { %37 = vrot.lane.b32.xlu0 %v30_v0, %s358_s21  ;;  %57 = vrot.lane.b32.xlu1 %v271_v2, %s359_s22  ;;  %s263_s16 = sshll.u32 %s362_s1, 4  ;;  %s264_s16 = int_to_ptr.vmem [resolvable:$true] %s263_s16 }
   0xf   :  { %s328_s17 = scalar_lea.vmem %s264_s16, 16  ;;  %s332_s18 = scalar_lea.vmem %s264_s16, 32 }
  0x10   :  { %p329_p0 = scmp.ne.s32.totalorder %s264_s16, %s328_s17  ;;  %p333_p1 = scmp.lt.s32.totalorder %s264_s16, %s264_s16 }
  0x11   :  { %p334_p2 = scmp.lt.s32.totalorder %s332_s18, %s328_s17 }
  0x12   :  { %62 = vrot.lane.b32.xlu0 %v271_v2, %s360_s23  ;;  %212 = vperm.xlu1 %326, %v205_v7  }
  0x13   :  { %p335_p3 = por %p334_p2, %p333_p1 }
  0x15   :  { %p336_p4 = pnand %p335_p3, %p329_p0 }
  0x16   :  { %217 = vperm.xlu0 %327, %v206_v9   ;;  %222 = vperm.xlu1 %326, %v207_v10  }
  0x1a   :  { %232 = vperm.xlu0 %327, %v209_v11   ;;  %227 = vperm.xlu1 %326, %v208_v12  }
  0x74   :  { %v50_v13 = vpop.permute.xlu0 %49  ;;  %v45_v14 = vpop.permute.xlu1 %44 }
  0x75   :  { %53 = vst.msk [vmem:[#allocation2 + $0x10] sm:$0xf] %vm52_vm5, %v50_v13 }
  0x76   :  { %48 = vst.msk [vmem:[#allocation2 + $0xc] sm:$0xf] %vm47_vm6, %v45_v14 }
  0x78   :  { %v78_v15 = vpop.permute.xlu0 %77  ;;  %v68_v16 = vpop.permute.xlu1 %67 }
  0x79   :  { %81 = vst.msk [vmem:[#allocation2 + $0x10] sm:$0xf] %vm80_vm7, %v78_v15 }
  0x7a   :  { %71 = vst.msk [vmem:[#allocation2 + $0x8] sm:$0xf] %vm70_vm8, %v68_v16 }
  0x7c   :  { %v73_v17 = vpop.permute.xlu0 %72  ;;  %v33_v18 = vpop.permute.xlu1 %32 }
  0x7d   :  { %76 = vst.msk [vmem:[#allocation2 + $0xc] sm:$0xf] %vm75_vm9, %v73_v17 }
  0x7e   :  { %36 = vst.msk [vmem:[#allocation2] sm:$0xf] %vm35_vm10, %v33_v18 }
  0x80   :  { %v38_v19 = vpop.permute.xlu0 %37  ;;  %v84_v20 = vld [vmem:[#allocation2 + $0x10] sm:$0x1f]  ;;  %v58_v21 = vpop.permute.xlu1 %57 }
  0x81   :  { %41 = vst.msk [vmem:[#allocation2 + $0x4] sm:$0xf] %vm40_vm11, %v38_v19  ;;  %287 = vmatpush3.msk.msra.mxu0 %vm106_vm12, %v84_v20  ;;  %310 = vmatpush3.msk.msra.mxu1 %vm106_vm12, %v84_v20 }
  0x82   :  { %61 = vst.msk [vmem:[#allocation2] sm:$0xf] %vm60_vm13, %v58_v21  ;;  %288 = vmatprep.subr.mxu0 %v352_v4  ;;  %308 = vmatprep.subr.mxu1 %v352_v4 }
  0x84   :  { %v63_v22 = vpop.permute.xlu0 %62  ;;  %v83_v23 = vld [vmem:[#allocation2 + $0x8] sm:$0xff] }
  0x85   :  { %66 = vst.msk [vmem:[#allocation2 + $0x4] sm:$0xf] %vm65_vm14, %v63_v22  ;;  %289 = vmatpush3.msra.mxu0 %v83_v23  ;;  %311 = vmatpush3.msra.mxu1 %v83_v23 }
  0x86   :  { %290 = vmatprep.subr.mxu0 %v352_v4  ;;  %309 = vmatprep.subr.mxu1 %v352_v4 }
  0x8c   :  { %v82_v26 = vld [vmem:[#allocation2] sm:$0xff] }
  0x8d   :  { %291 = vmatpush3.msra.mxu0 %v82_v26  ;;  %312 = vmatpush3.msra.mxu1 %v82_v26  ;;  %v213_v30 = vpop.permute.xlu1 %212 }
  0x8e   :  { %293 = vmatmul.mubr.msk.f32.vlgmr.msra.gmra.mxu0 %vm90_vm15, %v85_v24  ;;  %302 = vmatmul.mubr.msk.f32.vlgmr.msra.gmra.mxu1 %vm90_vm15, %v88_v25 }
  0x8f   :  { %295 = vmatprep.mubr.msk.f32.mxu0 %vm357_vm4, %v352_v4  ;;  %304 = vmatprep.mubr.msk.f32.mxu1 %vm357_vm4, %v352_v4 }
  0x91   :  { %v223_v33 = vpop.permute.xlu1 %222  ;;  %v218_v37 = vpop.permute.xlu0 %217 }
  0x92   :  { %296 = vmatmul.mubr.msk.f32.gmra.mxu0 %vm90_vm15, %v86_v27  ;;  %305 = vmatmul.mubr.msk.f32.gmra.mxu1 %vm90_vm15, %v89_v28 }
  0x93   :  { %298 = vmatprep.mubr.msk.f32.mxu0 %vm357_vm4, %v352_v4 }
  0x95   :  { %v228_v46 = vpop.permute.xlu1 %227  ;;  %v233_v51 = vpop.permute.xlu0 %232 }
  0x96   :  { %299 = vmatmul.mubr.msk.f32.gmra.mxu0 %vm90_vm15, %v87_v29 }
 0x14e   :  { %v176_v31 = vpop.f32.mrf.mxu0  ;;  %v191_v32 = vpop.f32.mrf.mxu1 }
 0x14f   :  { %v200_v36 = vmax.f32 %v176_v31, 0.0  ;;  %v203_v44 = vmax.f32 %v191_v32, 0.0 }
 0x150   :  { %v294_v34 = vpop.f32.mrf.mxu0  ;;  %v303_v35 = vpop.f32.mrf.mxu1 }
 0x151   :  { %v235_v43 = vmul.f32 %v213_v30, %v200_v36  ;;  %v238_v54 = vmul.f32 %v228_v46, %v203_v44 }
 0x152   :  { %v181_v38 = vpop.f32.mrf.mxu0  ;;  %v196_v39 = vpop.f32.mrf.mxu1 }
 0x153   :  { %v201_v40 = vmax.f32 %v181_v38, 0.0  ;;  %v204_v49 = vmax.f32 %v196_v39, 0.0  ;;  %v240_v53 = vsel %vm25_vm0, %v235_v43, 0.0  ;;  %v245_v60 = vsel %vm25_vm0, %v238_v54, 0.0 }
 0x154   :  { %v297_v41 = vpop.f32.mrf.mxu0  ;;  %v306_v42 = vpop.f32.mrf.mxu1 }
 0x155   :  { %v236_v45 = vmul.f32 %v218_v37, %v201_v40  ;;  %v239_v57 = vmul.f32 %v233_v51, %v204_v49 }
 0x156   :  { %v186_v47 = vpop.f32.mrf.mxu0 }
 0x157   :  { %v241_v48 = vsel %vm25_vm0, %v236_v45, 0.0  ;;  %v202_v50 = vmax.f32 %v186_v47, 0.0  ;;  %v248_v62 = vsel %vm247_vm1, %v239_v57, 0.0 }
 0x158   :  { %v300_v52 = vpop.f32.mrf.mxu0  ;;  %v242_v56 = vadd.f32 %v241_v48, %v240_v53 }
 0x159   :  { %v237_v55 = vmul.f32 %v223_v33, %v202_v50 }
 0x15b   :  { %v243_v58 = vsel %vm25_vm0, %v237_v55, 0.0 }
 0x15c   :  { %v244_v59 = vadd.f32 %v243_v58, %v242_v56 }
 0x15e   :  { %v246_v61 = vadd.f32 %v245_v60, %v244_v59 }
 0x160   :  { %v249_v63 = vadd.f32 %v248_v62, %v246_v61 }
 0x162   :  { %v250_v0 = vrot.slane %v249_v63, 4 }
 0x164   :  { %v251_v1 = vadd.f32 %v250_v0, %v249_v63 }
 0x166   :  { %v252_v2 = vrot.slane %v251_v1, 2 }
 0x168   :  { %v253_v3 = vadd.f32 %v252_v2, %v251_v1 }
 0x16a   :  { %v254_v4 = vrot.slane %v253_v3, 1 }
 0x16c   :  { %v255_v5 = vadd.f32 %v254_v4, %v253_v3 }
 0x16e   :  { %256 = vst.msk [vmem:[#allocation3] sm:$0x1] %vm247_vm1, %v255_v5 }
 0x16f   :  { %339 = shalt.err (!%p336_p4)
}
 0x170   :  { %266 = dma.vmem_to_hbm [thread:$0]  %s264_s16, 16, %s450_s3, [#allocation4]  }
 0x171   :  { %348 = dma.done.wait [#allocation4], 16  }
 0x172   :  { %349 = vsyncadd [#allocation4], 4294967280 }
 0x173   :  { %270 = vsyncpa [#allocation4], 1 }

</bundles_post_ra>
